<compile_context>
chip_gen: v6e
topology: v6e:2x2x1
jax: 0.10.0
libtpu: 0.0.40
codegen_flags: <defaults>
</compile_context>

<pallas_src>
import numpy as np
import jax
import jax.numpy as jnp
from jax.experimental import pallas as pl
from jax.experimental.pallas import tpu as pltpu

EPS = 1e-5
NUM_SPLITS = 2           # number of synthetic "worker nodes" (documented split)
NUM_CLASSES = 1000
BLOCKS = [3, 4, 6, 3]    # ResNet-50 bottleneck counts
PLANES = [64, 128, 256, 512]
EXPANSION = 4

ACT_DTYPE = jnp.bfloat16          # activation / weight dtype fed to the MXU
VMEM_LIMIT = 32 * 1024 * 1024     # fits 2-deep buffering on v5e/v6e/v7x

_VMEM_SPEC = pl.BlockSpec(memory_space=pltpu.MemorySpace.VMEM)


def _round_up(x, m):
    return ((x + m - 1) // m) * m


def distribute_channels(total_channels, num_splits):
    """SplitResnet.distribute_channels — kept for semantics documentation.
    The per-worker partial convs are computed fused (concat commutes)."""
    base = total_channels // num_splits
    rem = total_channels % num_splits
    parts = [base] * num_splits
    for i in range(rem):
        parts[i] += 1
    return parts


# ----------------------------- Pallas kernels -------------------------------

def _conv_bn_relu_kernel(p_ref, w_ref, shift_ref, o_ref):
    acc = jnp.dot(p_ref[...], w_ref[...], preferred_element_type=jnp.float32)
    y = acc + shift_ref[...]
    o_ref[...] = jnp.maximum(y, 0.0).astype(o_ref.dtype)


def _conv_bn_kernel(p_ref, w_ref, shift_ref, o_ref):
    acc = jnp.dot(p_ref[...], w_ref[...], preferred_element_type=jnp.float32)
    o_ref[...] = (acc + shift_ref[...]).astype(o_ref.dtype)


def _conv_bn_add_relu_kernel(p_ref, w_ref, shift_ref, r_ref, o_ref):
    acc = jnp.dot(p_ref[...], w_ref[...], preferred_element_type=jnp.float32)
    y = acc + shift_ref[...] + r_ref[...].astype(jnp.float32)
    o_ref[...] = jnp.maximum(y, 0.0).astype(o_ref.dtype)


def _maxpool_kernel(p_ref, o_ref):
    # p_ref: (kh*kw, TM, C) window slabs; bulk reduce-max over the window axis.
    o_ref[...] = jnp.max(p_ref[...], axis=0).astype(o_ref.dtype)


def _avgpool_fc_kernel(f_ref, w_ref, b_ref, o_ref):
    # f_ref: (N, HW, C); adaptive avg-pool to 1x1 then fully connected.
    pooled = jnp.mean(f_ref[...].astype(jnp.float32), axis=1)
    y = jnp.dot(pooled.astype(w_ref.dtype), w_ref[...],
                preferred_element_type=jnp.float32) + b_ref[...]
    o_ref[...] = y.astype(o_ref.dtype)


# ------------------------------ JAX glue ------------------------------------

def _im2col(x, kh, kw, stride, pad, pad_value=0.0):
    """x: (N,H,W,C) -> patches (N*OH*OW, kh*kw*C) in (kh,kw,C) order, plus OH, OW."""
    n, h, w, c = x.shape
    xp = jnp.pad(x, ((0, 0), (pad, pad), (pad, pad), (0, 0)),
                 constant_values=pad_value)
    oh = (h + 2 * pad - kh) // stride + 1
    ow = (w + 2 * pad - kw) // stride + 1
    cols = []
    for i in range(kh):
        for j in range(kw):
            cols.append(xp[:, i:i + stride * oh:stride, j:j + stride * ow:stride, :])
    patches = jnp.concatenate(cols, axis=-1)
    return patches.reshape(n * oh * ow, kh * kw * c), oh, ow


def _pool_slabs(x, kh, kw, stride, pad):
    """x: (N,H,W,C) -> (kh*kw, N*OH*OW, C) window slabs, -inf padded (torch MaxPool2d)."""
    n, h, w, c = x.shape
    xp = jnp.pad(x, ((0, 0), (pad, pad), (pad, pad), (0, 0)),
                 constant_values=-jnp.inf)
    oh = (h + 2 * pad - kh) // stride + 1
    ow = (w + 2 * pad - kw) // stride + 1
    slabs = []
    for i in range(kh):
        for j in range(kw):
            s = xp[:, i:i + stride * oh:stride, j:j + stride * ow:stride, :]
            slabs.append(s.reshape(n * oh * ow, c))
    return jnp.stack(slabs, axis=0), oh, ow


def _m_tiling(m, target=256):
    """Pick a row tile: full (lane/sublane-legal) block for small M, 256-row tiles else."""
    if m < target:
        m_pad = _round_up(m, 8)
        return m_pad, m_pad
    return _round_up(m, target), target


def distributed_conv_bn(x, p, stride, pad, relu=True, residual=None):
    """DistributedConv2d + folded BatchNorm (+ optional residual add + ReLU).

    The NUM_SPLITS worker partial convolutions (torch.cat(partial, dim=1)) are
    computed fused in a single pallas_call; the out-channel split is realized by
    the TN tiling of the output BlockSpec, which is mathematically identical."""
    kh, kw, cin, cout = p["kh"], p["kw"], p["cin"], p["cout"]
    n = x.shape[0]

    # DistributedConv2d input pruning x[:, is_input_channel_unpruned]:
    # identity for dense random weights -> gather skipped (decided at init).
    if p["keep"] is not None:
        x = jnp.take(x, jnp.asarray(p["keep"]), axis=-1)

    x = x.astype(ACT_DTYPE)
    if kh == 1 and kw == 1 and pad == 0:
        if stride != 1:
            x = x[:, ::stride, ::stride, :]
        oh, ow = x.shape[1], x.shape[2]
        patches = x.reshape(n * oh * ow, cin)
    else:
        patches, oh, ow = _im2col(x, kh, kw, stride, pad)

    M, K = patches.shape
    K_pad, N_pad = p["K_pad"], p["N_pad"]
    TN = 256 if N_pad % 256 == 0 else 128
    M_pad, TM = _m_tiling(M)

    if (M_pad, K_pad) != (M, K):
        patches = jnp.pad(patches, ((0, M_pad - M), (0, K_pad - K)))

    args = [patches, p["w2"], p["shift"]]
    in_specs = [
        pl.BlockSpec((TM, K_pad), lambda i, j: (i, 0)),   # patches row tile
        pl.BlockSpec((K_pad, TN), lambda i, j: (0, j)),   # folded weight col tile
        pl.BlockSpec((1, TN), lambda i, j: (0, j)),       # BN shift
    ]
    if residual is not None:
        r = residual.reshape(M, cout).astype(ACT_DTYPE)
        if (M_pad, N_pad) != (M, cout):
            r = jnp.pad(r, ((0, M_pad - M), (0, N_pad - cout)))
        args.append(r)
        in_specs.append(pl.BlockSpec((TM, TN), lambda i, j: (i, j)))
        kern = _conv_bn_add_relu_kernel
    else:
        kern = _conv_bn_relu_kernel if relu else _conv_bn_kernel

    out = pl.pallas_call(
        kern,
        out_shape=jax.ShapeDtypeStruct((M_pad, N_pad), ACT_DTYPE),
        grid_spec=pltpu.PrefetchScalarGridSpec(
            num_scalar_prefetch=0,
            grid=(M_pad // TM, N_pad // TN),
            in_specs=in_specs,
            out_specs=pl.BlockSpec((TM, TN), lambda i, j: (i, j)),
        ),
        compiler_params=pltpu.CompilerParams(
            dimension_semantics=("parallel", "parallel"),
            vmem_limit_bytes=VMEM_LIMIT,
        ),
    )(*args)

    return out[:M, :cout].reshape(n, oh, ow, cout)


def maxpool(x, k, stride, pad):
    n, h, w, c = x.shape
    slabs, oh, ow = _pool_slabs(x, k, k, stride, pad)   # (k*k, M, C)
    M = slabs.shape[1]
    M_pad, TM = _m_tiling(M)
    if M_pad != M:
        slabs = jnp.pad(slabs, ((0, 0), (0, M_pad - M), (0, 0)))
    out = pl.pallas_call(
        _maxpool_kernel,
        out_shape=jax.ShapeDtypeStruct((M_pad, c), x.dtype),
        grid_spec=pltpu.PrefetchScalarGridSpec(
            num_scalar_prefetch=0,
            grid=(M_pad // TM,),
            in_specs=[pl.BlockSpec((k * k, TM, c), lambda i: (0, i, 0))],
            out_specs=pl.BlockSpec((TM, c), lambda i: (i, 0)),
        ),
        compiler_params=pltpu.CompilerParams(
            dimension_semantics=("parallel",),
            vmem_limit_bytes=VMEM_LIMIT,
        ),
    )(slabs)
    return out[:M].reshape(n, oh, ow, c)


# --------------------------- parameter creation ------------------------------

def _make_conv_bn(key, cin, cout, k):
    fan_in = cin * k * k
    w = jax.random.normal(key, (k, k, cin, cout), jnp.float32) * np.sqrt(2.0 / fan_in)
    # Fresh torchvision BN defaults: gamma=1, beta=0, running_mean=0, running_var=1.
    gamma = jnp.ones((cout,), jnp.float32)
    beta = jnp.zeros((cout,), jnp.float32)
    mean = jnp.zeros((cout,), jnp.float32)
    var = jnp.ones((cout,), jnp.float32)
    scale = gamma / jnp.sqrt(var + EPS)
    shift = beta - mean * scale

    # Fold the BN scale into the conv weights (host side); only shift goes to VMEM.
    w_folded = w * scale[None, None, None, :]
    K = k * k * cin
    K_pad = _round_up(K, 128)            # MXU-friendly contracting dim
    N_pad = _round_up(cout, 128)         # lane-dense output channels
    w2 = jnp.zeros((K_pad, N_pad), jnp.float32)
    w2 = w2.at[:K, :cout].set(w_folded.reshape(K, cout))
    shift_p = jnp.zeros((1, N_pad), jnp.float32).at[0, :cout].set(shift)

    # SplitConv2d.is_input_channel_unpruned: sum over (O,H,W) != 0 per input channel.
    mask = np.asarray(jnp.sum(w, axis=(0, 1, 3)) != 0)
    keep = None if bool(mask.all()) else np.nonzero(mask)[0].astype(np.int32)

    # Per-worker channel distribution (documentation of the split semantics).
    _ = distribute_channels(cout, NUM_SPLITS)

    return {"w2": w2.astype(ACT_DTYPE), "shift": shift_p, "keep": keep,
            "kh": k, "kw": k, "cin": cin, "cout": cout,
            "K_pad": K_pad, "N_pad": N_pad}


def init_resnet50_params(key):
    params = {}
    key, k0 = jax.random.split(key)
    params["conv1"] = _make_conv_bn(k0, 3, 64, 7)
    in_ch = 64
    layers = []
    for li, (nblocks, planes) in enumerate(zip(BLOCKS, PLANES)):
        blocks = []
        layer_stride = 1 if li == 0 else 2
        for bi in range(nblocks):
            s = layer_stride if bi == 0 else 1
            key, k1, k2, k3, k4 = jax.random.split(key, 5)
            blk = {
                "conv1": _make_conv_bn(k1, in_ch, planes, 1),
                "conv2": _make_conv_bn(k2, planes, planes, 3),
                "conv3": _make_conv_bn(k3, planes, planes * EXPANSION, 1),
                "stride": s,
                "downsample": (_make_conv_bn(k4, in_ch, planes * EXPANSION, 1)
                               if (s != 1 or in_ch != planes * EXPANSION) else None),
            }
            blocks.append(blk)
            in_ch = planes * EXPANSION
        layers.append(blocks)
    params["layers"] = layers

    key, kf = jax.random.split(key)
    fc_w = jax.random.normal(kf, (in_ch, NUM_CLASSES), jnp.float32) * 0.01
    fc_b = jnp.zeros((NUM_CLASSES,), jnp.float32)
    fc_pad = _round_up(NUM_CLASSES, 128)          # 1024: lane-aligned FC output
    params["fc_w_pad"] = (jnp.zeros((in_ch, fc_pad), jnp.float32)
                          .at[:, :NUM_CLASSES].set(fc_w).astype(ACT_DTYPE))
    params["fc_b_pad"] = jnp.zeros((1, fc_pad), jnp.float32).at[0, :NUM_CLASSES].set(fc_b)
    return params


# ------------------------------- forward -------------------------------------

def distributed_resnet_forward(params, x_nchw):
    # layout: input is NCHW (PyTorch); transpose to NHWC for the kernels.
    x = jnp.transpose(x_nchw.astype(jnp.float32), (0, 2, 3, 1))

    # stem: conv1 (7x7 s2 p3) + bn + relu, maxpool 3x3 s2 p1
    x = distributed_conv_bn(x, params["conv1"], stride=2, pad=3, relu=True)
    x = maxpool(x, 3, 2, 1)

    # bottleneck layers
    for blocks in params["layers"]:
        for blk in blocks:
            identity = x
            out = distributed_conv_bn(x, blk["conv1"], 1, 0, relu=True)
            out = distributed_conv_bn(out, blk["conv2"], blk["stride"], 1, relu=True)
            if blk["downsample"] is not None:
                identity = distributed_conv_bn(x, blk["downsample"],
                                               blk["stride"], 0, relu=False)
            # conv3 + bn3 + residual add + relu (fused)
            x = distributed_conv_bn(out, blk["conv3"], 1, 0, residual=identity)

    # adaptive avgpool (1,1) + fc, fused in one small Pallas kernel (lane-padded)
    n, h, w, c = x.shape
    feats = x.reshape(n, h * w, c).astype(ACT_DTYPE)
    fc_pad = params["fc_w_pad"].shape[1]
    logits_p = pl.pallas_call(
        _avgpool_fc_kernel,
        out_shape=jax.ShapeDtypeStruct((n, fc_pad), jnp.float32),
        in_specs=[_VMEM_SPEC, _VMEM_SPEC, _VMEM_SPEC],
        out_specs=_VMEM_SPEC,
        compiler_params=pltpu.CompilerParams(vmem_limit_bytes=VMEM_LIMIT),
    )(feats, params["fc_w_pad"], params["fc_b_pad"])
    return logits_p[:, :NUM_CLASSES]


# --------------------------------- main ---------------------------------------

if __name__ == "__main__":
    key = jax.random.PRNGKey(0)
    pkey, xkey = jax.random.split(key)
    params = init_resnet50_params(pkey)

    # Small NCHW input (PyTorch convention): batch=2, 3 channels, 32x32 spatial.
    x = jax.random.normal(xkey, (2, 3, 32, 32), jnp.float32)

    out = distributed_resnet_forward(params, x)
    out = jax.block_until_ready(out)
    assert out.shape == (2, NUM_CLASSES)
    assert bool(jnp.all(jnp.isfinite(out)))
    print("KERNEL_OK")
</pallas_src>

<mosaic_0001>
module attributes {stable_mosaic.version = 11 : i64} {
  func.func @_conv_bn_relu_kernel(%arg0: i32, %arg1: i32, %arg2: memref<256x256xbf16, #tpu.memory_space<vmem>>, %arg3: memref<256x128xbf16, #tpu.memory_space<vmem>>, %arg4: memref<1x128xf32, #tpu.memory_space<vmem>>, %arg5: memref<256x128xbf16, #tpu.memory_space<vmem>>) attributes {dimension_semantics = [#tpu.dimension_semantics<parallel>, #tpu.dimension_semantics<parallel>], iteration_bounds = array<i64: 2, 1>, scalar_prefetch = 0 : i64, scratch_operands = 0 : i64, tpu.core_type = #tpu.core_type<tc>, window_params = [{transform_indices = @transform_0, window_bounds = array<i64: 256, 256>}, {transform_indices = @transform_1, window_bounds = array<i64: 256, 128>}, {transform_indices = @transform_2, window_bounds = array<i64: 1, 128>}, {transform_indices = @transform_3, window_bounds = array<i64: 256, 128>}]} {
    %c0 = arith.constant 0 : index
    %c0_0 = arith.constant 0 : index
    %0 = vector.load %arg2[%c0, %c0_0] : memref<256x256xbf16, #tpu.memory_space<vmem>>, vector<256x256xbf16>
    %c0_1 = arith.constant 0 : index
    %c0_2 = arith.constant 0 : index
    %1 = vector.load %arg3[%c0_1, %c0_2] : memref<256x128xbf16, #tpu.memory_space<vmem>>, vector<256x128xbf16>
    %cst = arith.constant dense<0.000000e+00> : vector<256x128xf32>
    %2 = tpu.matmul %0, %1, %cst {dimension_numbers = #tpu.dot_dimension_numbers<[1], [0], [0], [1], [0, 0, 1, 1], [], []>} : vector<256x256xbf16>, vector<256x128xbf16>, vector<256x128xf32> -> vector<256x128xf32>
    %c0_3 = arith.constant 0 : index
    %c0_4 = arith.constant 0 : index
    %3 = vector.load %arg4[%c0_3, %c0_4] : memref<1x128xf32, #tpu.memory_space<vmem>>, vector<1x128xf32>
    %4 = vector.broadcast %3 : vector<1x128xf32> to vector<256x128xf32>
    %5 = arith.addf %2, %4 : vector<256x128xf32>
    %cst_5 = arith.constant 0.000000e+00 : f32
    %6 = vector.broadcast %cst_5 : f32 to vector<256x128xf32>
    %7 = arith.maximumf %5, %6 : vector<256x128xf32>
    %8 = arith.truncf %7 : vector<256x128xf32> to vector<256x128xbf16>
    %c0_6 = arith.constant 0 : index
    %c0_7 = arith.constant 0 : index
    %9 = vector.load %arg5[%c0_6, %c0_7] : memref<256x128xbf16, #tpu.memory_space<vmem>>, vector<256x128xbf16>
    tpu.vector_store %arg5[%c0_6, %c0_7], %8 {strides = array<i32>} : memref<256x128xbf16, #tpu.memory_space<vmem>>, vector<256x128xbf16>,
    return
  }
  func.func @transform_0(%arg0: i32, %arg1: i32) -> (i32, i32) {
    %c0_i32 = arith.constant 0 : i32
    %c0_i32_0 = arith.constant 0 : i32
    return %arg0, %c0_i32 : i32, i32
  }
  func.func @transform_1(%arg0: i32, %arg1: i32) -> (i32, i32) {
    %c0_i32 = arith.constant 0 : i32
    %c0_i32_0 = arith.constant 0 : i32
    return %c0_i32, %arg1 : i32, i32
  }
  func.func @transform_2(%arg0: i32, %arg1: i32) -> (i32, i32) {
    %c0_i32 = arith.constant 0 : i32
    %c0_i32_0 = arith.constant 0 : i32
    return %c0_i32, %arg1 : i32, i32
  }
  func.func @transform_3(%arg0: i32, %arg1: i32) -> (i32, i32) {
    %c0_i32 = arith.constant 0 : i32
    return %arg0, %arg1 : i32, i32
  }
}

</mosaic_0001>

<bundles_post_ra>
// kernel: tpu_custom_call.1
= control target key start
LH: loop header
LB: loop body
LE: loop exit
PB: predicated region body
PF: predicated region fallthrough
CT: control target
= control target key end

     0   :  { %8 = vsyncpa [#allocation3], 0  ;;  %s1987_s0 = inlined_call_operand.hbm [shape: bf16[512,256], index: 0, kind: input, shape index: {}]   ;;  %s1988_s1 = inlined_call_operand.hbm [shape: bf16[256,128], index: 1, kind: input, shape index: {}]   ;;  %s1989_s2 = inlined_call_operand.vmem [shape: f32[1,128], index: 2, kind: input, shape index: {}]   ;;  %s1990_s3 = inlined_call_operand.hbm [shape: bf16[512,128], index: 3, kind: output, shape index: {}]  }
   0x1   :  { %10 = vsyncpa [#allocation3 + $0x1], 0 }
   0x2   :  { %11 = vsyncpa [#allocation6], 0 }
   0x3   :  { %12 = vsyncpa [#allocation4], 0 }
   0x4   :  { %14 = vsyncpa [#allocation4 + $0x1], 0  ;;  %s1715_s12 = smov 0   ;;  %s1717_s13 = smov 0  }
   0x5   :  { %s1719_s14 = smov 0   ;;  %s1721_s15 = smov 0  }
   0x6   :  { %s1723_s16 = smov 0   ;;  %s1725_s17 = smov 0  }
   0x7 LB: > { %s1045_s18 = sadd.s32 4294967295, %s1684_s17   ;;  %s1046_s19 = sadd.s32 4294967294, %s1684_s17   ;;  %s1684_s17 = sphi %s1725_s17, %s20_s17   ;;  %s1680_s16 = sphi %s1723_s16, %s2008_s16   ;;  %s1676_s15 = sphi %s1721_s15, %s2007_s15   ;;  %s1672_s14 = sphi %s1719_s14, %s2006_s14   ;;  %s1668_s13 = sphi %s1717_s13, %s2005_s13   ;;  %s1664_s12 = sphi %s1715_s12, %s2004_s12  }
   0x8   : > { %p52_p0 = scmp.ne.s32.totalorder %s1668_s13, %s1664_s12  ;;  %p1749_p1 = scmp.eq.s32.totalorder %s1045_s18, 0 }
   0x9   : > { %p1753_p2 = scmp.eq.s32.totalorder %s1045_s18, 1  ;;  %p136_p3 = scmp.eq.s32.totalorder %s1046_s19, 1 }
   0xa   : > { %p1759_p4 = por %p1749_p1, %p52_p0  ;;  %p1047_p5 = scmp.ge.s32.totalorder %s1684_s17, 1 }
   0xb   : > { %p1764_p6 = por %p136_p3, %p52_p0  ;;  %p143_p7 = scmp.lt.s32.totalorder %s1684_s17, 3 }
   0xc   : > { %s1994_s22 = scalar_select %p1759_p4, 1, 0 }
   0xd   : > { %s1995_s23 = scalar_select %p1764_p6, 1, 0 }
   0xe   : > { %p1769_p8 = pnand %p1047_p5, %p143_p7  ;;  %s1686_s25 = smov [#allocation5]  }
   0xf   : > { %s157_s26 = sshll.u32 %s1686_s25, 4  ;;  %s32_s28 = sadd.s32 1, %s1680_s16  ;;  %s158_s26 = int_to_ptr.vmem [resolvable:$true] %s157_s26 }
  0x10   : > { %p1411_p9 = pneg %p1769_p8  ;;  %s1557_s29 = scalar_lea.vmem %s158_s26, 2048 }
  0x11   : > { %p1558_p13 = scmp.ne.s32.totalorder %s158_s26, %s1557_s29  ;;  %p1565_p5 = scmp.lt.s32.totalorder %s158_s26, %s158_s26 }
  0x12   : > { %p1778_p11 = pnand %p1411_p9, %p1749_p1  ;;  %p1566_p7 = scmp.lt.s32.totalorder %s1557_s29, %s1557_s29 }
  0x14   : > { %p1548_p12 = pneg %p1778_p11  ;;  %p1567_p6 = por %p1566_p7, %p1565_p5 }
  0x16   : > { %p1560_p0 = pnand %p1558_p13, %p1548_p12 }
  0x18   : > { %p1561_p3 = pneg %p1560_p0 }
  0x1a   : > { %p1568_p4 = pnand %p1567_p6, %p1561_p3 }
  0x1c   : > { %1571 = shalt.err (!%p1568_p4)
}
  0x1d   : > { %s1687_s30 = smov 64   ;;  %s1688_s4 = smov 4  }
  0x1e   : > { %1414 = dma.hbm_to_vmem [thread:$0]  (!%p1778_p11), %s1988_s1, 2048, %s158_s26, [#allocation6], %s1687_s30, %s1687_s30, %s1688_s4  }
  0x1f   : > { %p34_p6 = scmp.ge.s32.totalorder %s32_s28, 2  ;;  %s39_s7 = sadd.s32 1, %s1672_s14 }
  0x20   : > { %p46_p4 = scmp.ne.s32.totalorder %s1672_s14, %s1668_s13  ;;  %p47_p9 = scmp.eq.s32.totalorder %s1684_s17, 0 }
  0x21   : > { %s2010_s28 = smov (%p34_p6, %s32_s28), 0  ;;  %p1424_p0 = scmp.lt.s32.totalorder %s1684_s17, 2 }
  0x22   : > { %p1796_p12 = por %p47_p9, %p46_p4  ;;  %p1802_p13 = por %p1753_p2, %p46_p4 }
  0x23   : > { %s36_s10 = ssub.s32 %s1680_s16, %s2010_s28  ;;  %s177_s11 = sand.u32 1, %s1672_s14  }
  0x24   : > { %p37_p11 = scmp.eq.s32.totalorder %s36_s10, 0  ;;  %s1051_s18 = sshll.u32 %s177_s11, 8 }
  0x25   : > { %s1146_s25 = sshll.u32 %s1680_s16, 12  ;;  %s181_s30 = scalar_lea.vmem [#allocation2], %s1051_s18 }
  0x26   : > { %s1811_s19 = scalar_select %p37_p11, %s1672_s14, %s39_s7  }
  0x27   : > { %s188_s29 = scalar_lea.hbm %s1987_s0, %s1146_s25  ;;  %s189_s4 = sshll.u32 %s181_s30, 4  ;;  %s190_s4 = int_to_ptr.vmem [resolvable:$true] %s189_s4 }
  0x28   : > { %p1819_p2 = pnand %p1424_p0, %p1796_p12  ;;  %s178_s5 = scalar_lea.sflag [#allocation3], %s177_s11 }
  0x29   : > { %s1585_s6 = scalar_lea.vmem %s190_s4, 4096  ;;  %s1689_s7 = smov [#allocation2]  }
  0x2a   : > { %p1574_p3 = pneg %p1819_p2  ;;  %p1586_p5 = scmp.ne.s32.totalorder %s190_s4, %s1585_s6 }
  0x2b   : > { %s1590_s10 = sshll.u32 %s1689_s7, 4  ;;  %s1591_s10 = int_to_ptr.vmem [resolvable:$false] %s1590_s10 }
  0x2c   : > { %p1588_p7 = pnand %p1586_p5, %p1574_p3  ;;  %s1592_s25 = scalar_lea.vmem %s1591_s10, 8192 }
  0x2d   : > { %p1593_p4 = scmp.lt.s32.totalorder %s190_s4, %s1591_s10  ;;  %p1594_p9 = scmp.lt.s32.totalorder %s1592_s25, %s1585_s6 }
  0x2e   : > { %p1589_p6 = pneg %p1588_p7 }
  0x2f   : > { %p1595_p11 = por %p1594_p9, %p1593_p4 }
  0x31   : > { %p1596_p10 = pnand %p1595_p11, %p1589_p6 }
  0x33   : > { %1599 = shalt.err (!%p1596_p10)
}
  0x34   : > { %s1690_s8 = smov 128   ;;  %s1691_s18 = smov 8  }
  0x35   : > { %1418 = dma.hbm_to_vmem [thread:$0]  (!%p1819_p2), %s188_s29, 4096, %s190_s4, %s178_s5, %s1690_s8, %s1690_s8, %s1691_s18  }
  0x36   : > { %201 = sbr.rel (%p1769_p8) target bundleno = 372 (0x174), region = 32  ;;  %s1830_s11 = sand.u32 (!%p1769_p8), 1, %s1668_s13  }
  0x37   : > { %s1056_s26 = sshll.u32 (!%p1769_p8), %s1830_s11, 8  ;;  %s204_s27 = scalar_lea.sflag (!%p1769_p8), [#allocation3], %s1830_s11 }
  0x38   : > { %s1834_s30 = scalar_lea.vmem (!%p1769_p8), [#allocation2], %s1056_s26  ;;  %p2001_p12 = scmp.ne.s32.totalorder (!%p1769_p8), %s1994_s22, 0 }
  0x3b   : > { %1651 = dma.done.wait (%p2001_p12), %s204_s27, 4096  }
  0x3c   : > { %1653 = vsyncadd (%p2001_p12), %s204_s27, 4294963200 }
  0x3d   : > { %1655 = dma.done.wait (%p1749_p1), [#allocation6], 2048  }
  0x3e   : > { %1657 = vsyncadd (%p1749_p1), [#allocation6], 4294965248  ;;  %v1482_v0 = vld [vmem:[#allocation5 + $0x78] sm:$0xff]   ;;  %v1484_v2 = vld [vmem:[#allocation5 + $0x70] sm:$0xff]   ;;  %s1058_s24 = sshll.u32 %s1830_s11, 7  ;;  %s1179_s4 = sshll.u32 %s1676_s15, 11 }
  0x3f   : > { %v1483_v1 = vld [vmem:[#allocation5 + $0x38] sm:$0xff]   ;;  %1275 = vmatprep.subr.bf16.mxu0 %v1482_v0  ;;  %1387 = vmatprep.subr.bf16.mxu1 %v1482_v0  ;;  %v1485_v3 = vld [vmem:[#allocation5 + $0x30] sm:$0xff]   ;;  %v1486_v4 = vld [vmem:[#allocation5 + $0x68] sm:$0xff]   ;;  %s1888_s29 = scalar_lea.vmem [#allocation7], %s1058_s24  ;;  %s1935_s7 = scalar_lea.hbm %s1990_s3, %s1179_s4 }
  0x40   : > { %1276 = vmatpush3.bf16.msra.mxu0 %v1483_v1  ;;  %1395 = vmatpush3.bf16.msra.mxu1 %v1483_v1  ;;  %v1487_v5 = vld [vmem:[#allocation5 + $0x28] sm:$0xff]   ;;  %v1488_v6 = vld [vmem:[#allocation5 + $0x60] sm:$0xff]   ;;  %v1490_v8 = vld [vmem:[#allocation5 + $0x58] sm:$0xff]   ;;  %s938_s21 = sshll.u32 %s1888_s29, 4  ;;  %s924_s15 = scalar_lea.sflag [#allocation4], %s1830_s11  ;;  %s1937_s21 = int_to_ptr.vmem [resolvable:$true] %s938_s21 }
  0x41   : > { %1277 = vmatprep.subr.bf16.mxu0 %v1484_v2  ;;  %1388 = vmatprep.subr.bf16.mxu1 %v1484_v2  ;;  %v1489_v7 = vld [vmem:[#allocation5 + $0x20] sm:$0xff]   ;;  %v1491_v9 = vld [vmem:[#allocation5 + $0x18] sm:$0xff]   ;;  %v1492_v10 = vld [vmem:[#allocation5 + $0x50] sm:$0xff]   ;;  %s1600_s10 = scalar_lea.vmem %s1937_s21, 2048  ;;  %s1692_s25 = smov [#allocation7]  }
  0x42   : > { %v1500_v11 = vld [vmem:[%s1834_s30 + $0x4] ss:$8 sps:$4 sm:$0xff]   ;;  %v1493_v13 = vld [vmem:[#allocation5 + $0x10] sm:$0xff]   ;;  %v1498_v18 = vld [vmem:[%s1834_s30] ss:$8 sps:$4 sm:$0xff]   ;;  %p1601_p1 = scmp.ne.s32.totalorder %s1937_s21, %s1600_s10  ;;  %s1604_s8 = sshll.u32 %s1692_s25, 4  ;;  %s1605_s8 = int_to_ptr.vmem [resolvable:$false] %s1604_s8 }
  0x43   : > { %v1503_v12 = vld [vmem:[%s1834_s30 + $0x84] ss:$8 sps:$4 sm:$0xff]   ;;  %602 = vmatprep.mubr.bf16.mxu0 %v1500_v11  ;;  %v1501_v19 = vld [vmem:[%s1834_s30 + $0x80] ss:$8 sps:$4 sm:$0xff]   ;;  %v1504_v20 = vld [vmem:[%s1834_s30 + $0x14] ss:$8 sps:$4 sm:$0xff]   ;;  %p1607_p0 = scmp.lt.s32.totalorder %s1937_s21, %s1605_s8 }
  0x44   : > { %1278 = vmatpush3.bf16.msra.mxu0 %v1485_v3  ;;  %1396 = vmatpush3.bf16.msra.mxu1 %v1485_v3  ;;  %v1494_v14 = vld [vmem:[#allocation5 + $0x48] sm:$0xff]   ;;  %v1496_v16 = vld [vmem:[#allocation5 + $0x40] sm:$0xff]   ;;  %v1506_v21 = vld [vmem:[%s1834_s30 + $0x94] ss:$8 sps:$4 sm:$0xff]   ;;  %p1602_p8 = pnand %p1601_p1, %p1802_p13  ;;  %s1606_s18 = scalar_lea.vmem %s1605_s8, 4096 }
  0x45   : > { %1279 = vmatprep.subr.bf16.mxu0 %v1486_v4  ;;  %1389 = vmatprep.subr.bf16.mxu1 %v1486_v4  ;;  %v1495_v15 = vld [vmem:[#allocation5 + $0x8] sm:$0xff]   ;;  %v1497_v17 = vld [vmem:[#allocation5] sm:$0xff]   ;;  %v1508_v22 = vld [vmem:[%s1834_s30 + $0x10] ss:$8 sps:$4 sm:$0xff]   ;;  %p1608_p2 = scmp.lt.s32.totalorder %s1606_s18, %s1600_s10 }
  0x46   : > { %666 = vmatprep.mubr.bf16.mxu1 %v1503_v12  ;;  %v1509_v23 = vld [vmem:[%s1834_s30 + $0x90] ss:$8 sps:$4 sm:$0xff]   ;;  %v1510_v24 = vld [vmem:[%s1834_s30 + $0x24] ss:$8 sps:$4 sm:$0xff]   ;;  %v1514_v26 = vld [vmem:[%s1834_s30 + $0x20] ss:$8 sps:$4 sm:$0xff]   ;;  %p1603_p10 = pneg %p1602_p8 }
  0x47   : > { %v1512_v25 = vld [vmem:[%s1834_s30 + $0xa4] ss:$8 sps:$4 sm:$0xff]   ;;  %v1515_v27 = vld [vmem:[%s1834_s30 + $0xa0] ss:$8 sps:$4 sm:$0xff]   ;;  %v1516_v28 = vld [vmem:[%s1834_s30 + $0x34] ss:$8 sps:$4 sm:$0xff]   ;;  %p1609_p3 = por %p1608_p2, %p1607_p0 }
  0x48   : > { %1280 = vmatpush3.bf16.msra.mxu0 %v1487_v5  ;;  %1397 = vmatpush3.bf16.msra.mxu1 %v1487_v5  ;;  %v1518_v29 = vld [vmem:[%s1834_s30 + $0xb4] ss:$8 sps:$4 sm:$0xff]   ;;  %v1520_v30 = vld [vmem:[%s1834_s30 + $0x30] ss:$8 sps:$4 sm:$0xff]   ;;  %v1522_v32 = vld [vmem:[%s1834_s30 + $0x44] ss:$8 sps:$4 sm:$0xff]  }
  0x49   : > { %1281 = vmatprep.subr.bf16.mxu0 %v1488_v6  ;;  %1390 = vmatprep.subr.bf16.mxu1 %v1488_v6  ;;  %v1521_v31 = vld [vmem:[%s1834_s30 + $0xb0] ss:$8 sps:$4 sm:$0xff]   ;;  %v1524_v33 = vld [vmem:[%s1834_s30 + $0xc4] ss:$8 sps:$4 sm:$0xff]   ;;  %v1526_v34 = vld [vmem:[%s1834_s30 + $0x40] ss:$8 sps:$4 sm:$0xff]   ;;  %p1610_p5 = pnand %p1609_p3, %p1603_p10 }
  0x4a   : > { %v1527_v35 = vld [vmem:[%s1834_s30 + $0xc0] ss:$8 sps:$4 sm:$0xff]   ;;  %v1528_v36 = vld [vmem:[%s1834_s30 + $0x54] ss:$8 sps:$4 sm:$0xff]   ;;  %v1532_v38 = vld [vmem:[%s1834_s30 + $0x50] ss:$8 sps:$4 sm:$0xff]  }
  0x4b   : > { %v1530_v37 = vld [vmem:[%s1834_s30 + $0xd4] ss:$8 sps:$4 sm:$0xff]   ;;  %v1533_v39 = vld [vmem:[%s1834_s30 + $0xd0] ss:$8 sps:$4 sm:$0xff]   ;;  %v1534_v40 = vld [vmem:[%s1834_s30 + $0x64] ss:$8 sps:$4 sm:$0xff]  }
  0x4c   : > { %1282 = vmatpush3.bf16.msra.mxu0 %v1489_v7  ;;  %1398 = vmatpush3.bf16.msra.mxu1 %v1489_v7  ;;  %v1536_v41 = vld [vmem:[%s1834_s30 + $0xe4] ss:$8 sps:$4 sm:$0xff]   ;;  %v1538_v42 = vld [vmem:[%s1834_s30 + $0x60] ss:$8 sps:$4 sm:$0xff]   ;;  %v1540_v44 = vld [vmem:[%s1834_s30 + $0x74] ss:$8 sps:$4 sm:$0xff]  }
  0x4d   : > { %1283 = vmatprep.subr.bf16.mxu0 %v1490_v8  ;;  %1391 = vmatprep.subr.bf16.mxu1 %v1490_v8  ;;  %v1539_v43 = vld [vmem:[%s1834_s30 + $0xe0] ss:$8 sps:$4 sm:$0xff]   ;;  %v1542_v45 = vld [vmem:[%s1834_s30 + $0xf4] ss:$8 sps:$4 sm:$0xff]   ;;  %v1544_v46 = vld [vmem:[%s1834_s30 + $0x70] ss:$8 sps:$4 sm:$0xff]  }
  0x4e   : > { %v1545_v47 = vld [vmem:[%s1834_s30 + $0xf0] ss:$8 sps:$4 sm:$0xff]   ;;  %v1879_v52 = vld [vmem:[%s1989_s2] ss:$0 sm:$0xff] }
  0x50   : > { %1284 = vmatpush3.bf16.msra.mxu0 %v1491_v9  ;;  %1399 = vmatpush3.bf16.msra.mxu1 %v1491_v9 }
  0x51   : > { %1285 = vmatprep.subr.bf16.mxu0 %v1492_v10  ;;  %1392 = vmatprep.subr.bf16.mxu1 %v1492_v10 }
  0x54   : > { %1286 = vmatpush3.bf16.msra.mxu0 %v1493_v13  ;;  %1400 = vmatpush3.bf16.msra.mxu1 %v1493_v13 }
  0x55   : > { %1287 = vmatprep.subr.bf16.mxu0 %v1494_v14  ;;  %1393 = vmatprep.subr.bf16.mxu1 %v1494_v14 }
  0x58   : > { %1288 = vmatpush3.bf16.msra.mxu0 %v1495_v15  ;;  %1401 = vmatpush3.bf16.msra.mxu1 %v1495_v15 }
  0x59   : > { %1289 = vmatprep.subr.bf16.mxu0 %v1496_v16  ;;  %1394 = vmatprep.subr.bf16.mxu1 %v1496_v16 }
  0x5c   : > { %1290 = vmatpush3.bf16.msra.mxu0 %v1497_v17  ;;  %1402 = vmatpush3.bf16.msra.mxu1 %v1497_v17 }
  0x5f   : > { %603 = vmatmul.mubr.bf16.vlgmr.msra.gmra.mxu0 %v1498_v18  ;;  %667 = vmatmul.mubr.bf16.vlgmr.msra.gmra.mxu1 %v1501_v19 }
  0x60   : > { %610 = vmatprep.mubr.bf16.mxu0 %v1504_v20  ;;  %674 = vmatprep.mubr.bf16.mxu1 %v1506_v21 }
  0x67   : > { %611 = vmatmul.mubr.bf16.gmra.mxu0 %v1508_v22  ;;  %675 = vmatmul.mubr.bf16.gmra.mxu1 %v1509_v23 }
  0x68   : > { %618 = vmatprep.mubr.bf16.mxu0 %v1510_v24  ;;  %682 = vmatprep.mubr.bf16.mxu1 %v1512_v25 }
  0x6f   : > { %619 = vmatmul.mubr.bf16.gmra.mxu0 %v1514_v26  ;;  %683 = vmatmul.mubr.bf16.gmra.mxu1 %v1515_v27 }
  0x70   : > { %626 = vmatprep.mubr.bf16.mxu0 %v1516_v28  ;;  %690 = vmatprep.mubr.bf16.mxu1 %v1518_v29 }
  0x77   : > { %627 = vmatmul.mubr.bf16.gmra.mxu0 %v1520_v30  ;;  %691 = vmatmul.mubr.bf16.gmra.mxu1 %v1521_v31 }
  0x78   : > { %634 = vmatprep.mubr.bf16.mxu0 %v1522_v32  ;;  %698 = vmatprep.mubr.bf16.mxu1 %v1524_v33 }
  0x7f   : > { %635 = vmatmul.mubr.bf16.gmra.mxu0 %v1526_v34  ;;  %699 = vmatmul.mubr.bf16.gmra.mxu1 %v1527_v35 }
  0x80   : > { %642 = vmatprep.mubr.bf16.mxu0 %v1528_v36  ;;  %706 = vmatprep.mubr.bf16.mxu1 %v1530_v37 }
  0x87   : > { %643 = vmatmul.mubr.bf16.gmra.mxu0 %v1532_v38  ;;  %707 = vmatmul.mubr.bf16.gmra.mxu1 %v1533_v39 }
  0x88   : > { %650 = vmatprep.mubr.bf16.mxu0 %v1534_v40  ;;  %714 = vmatprep.mubr.bf16.mxu1 %v1536_v41 }
  0x8f   : > { %651 = vmatmul.mubr.bf16.gmra.mxu0 %v1538_v42  ;;  %715 = vmatmul.mubr.bf16.gmra.mxu1 %v1539_v43 }
  0x90   : > { %658 = vmatprep.mubr.bf16.mxu0 %v1540_v44  ;;  %722 = vmatprep.mubr.bf16.mxu1 %v1542_v45 }
  0x97   : > { %659 = vmatmul.mubr.bf16.gmra.mxu0 %v1544_v46  ;;  %723 = vmatmul.mubr.bf16.gmra.mxu1 %v1545_v47 }
 0x11f   : > { %v1291_v48 = vpop.f32.mrf.mxu0  ;;  %v1339_v49 = vpop.f32.mrf.mxu1 }
 0x121   : > { %v1292_v50 = vpop.f32.mrf.mxu0  ;;  %v1340_v51 = vpop.f32.mrf.mxu1 }
 0x122   : > { %v1293_v53 = vadd.f32 %v1292_v50, %v1291_v48  ;;  %v1341_v54 = vadd.f32 %v1340_v51, %v1339_v49 }
 0x123   : > { %v1294_v55 = vpop.f32.mrf.mxu0  ;;  %v1342_v56 = vpop.f32.mrf.mxu1 }
 0x124   : > { %v605_v57 = vadd.f32 %v1293_v53, %v1879_v52  ;;  %v669_v58 = vadd.f32 %v1341_v54, %v1879_v52 }
 0x125   : > { %v1295_v59 = vpop.f32.mrf.mxu0  ;;  %v1343_v60 = vpop.f32.mrf.mxu1 }
 0x126   : > { %v1296_v61 = vadd.f32 %v1295_v59, %v1294_v55  ;;  %v1344_v62 = vadd.f32 %v1343_v60, %v1342_v56  ;;  %v731_v3 = vmax.f32 %v605_v57, 0.0  ;;  %v747_v4 = vmax.f32 %v669_v58, 0.0 }
 0x127   : > { %v1297_v63 = vpop.f32.mrf.mxu0  ;;  %v1345_v0 = vpop.f32.mrf.mxu1 }
 0x128   : > { %v608_v1 = vadd.f32 %v1296_v61, %v1879_v52  ;;  %v672_v2 = vadd.f32 %v1344_v62, %v1879_v52 }
 0x129   : > { %v1298_v5 = vpop.f32.mrf.mxu0  ;;  %v1346_v6 = vpop.f32.mrf.mxu1 }
 0x12a   : > { %v732_v7 = vmax.f32 %v608_v1, 0.0  ;;  %v748_v8 = vmax.f32 %v672_v2, 0.0  ;;  %v1299_v9 = vadd.f32 %v1298_v5, %v1297_v63  ;;  %v1347_v10 = vadd.f32 %v1346_v6, %v1345_v0 }
 0x12b   : > { %v1300_v11 = vpop.f32.mrf.mxu0  ;;  %v1348_v12 = vpop.f32.mrf.mxu1 }
 0x12c   : > { %v1183_v13 = vpack.c.bf16 %v732_v7, %v731_v3  ;;  %v1223_v14 = vpack.c.bf16 %v748_v8, %v747_v4  ;;  %v613_v15 = vadd.f32 %v1299_v9, %v1879_v52  ;;  %v677_v16 = vadd.f32 %v1347_v10, %v1879_v52 }
 0x12d   : > { %v1301_v17 = vpop.f32.mrf.mxu0  ;;  %v1349_v18 = vpop.f32.mrf.mxu1 }
 0x12e   : > { %1184 = vst [vmem:[%s1888_s29] sm:$0xff] %v1183_v13   ;;  %1267 = vst [vmem:[%s1888_s29 + $0x40] sm:$0xff] %v1223_v14   ;;  %v1302_v19 = vadd.f32 %v1301_v17, %v1300_v11  ;;  %v1350_v20 = vadd.f32 %v1349_v18, %v1348_v12  ;;  %v733_v25 = vmax.f32 %v613_v15, 0.0  ;;  %v749_v26 = vmax.f32 %v677_v16, 0.0 }
 0x12f   : > { %v1303_v21 = vpop.f32.mrf.mxu0  ;;  %v1351_v22 = vpop.f32.mrf.mxu1 }
 0x130   : > { %v616_v23 = vadd.f32 %v1302_v19, %v1879_v52  ;;  %v680_v24 = vadd.f32 %v1350_v20, %v1879_v52 }
 0x131   : > { %v1304_v27 = vpop.f32.mrf.mxu0  ;;  %v1352_v28 = vpop.f32.mrf.mxu1 }
 0x132   : > { %v734_v29 = vmax.f32 %v616_v23, 0.0  ;;  %v750_v30 = vmax.f32 %v680_v24, 0.0  ;;  %v1305_v31 = vadd.f32 %v1304_v27, %v1303_v21  ;;  %v1353_v32 = vadd.f32 %v1352_v28, %v1351_v22 }
 0x133   : > { %v1306_v33 = vpop.f32.mrf.mxu0  ;;  %v1354_v34 = vpop.f32.mrf.mxu1 }
 0x134   : > { %v1188_v35 = vpack.c.bf16 %v734_v29, %v733_v25  ;;  %v1228_v36 = vpack.c.bf16 %v750_v30, %v749_v26  ;;  %v621_v37 = vadd.f32 %v1305_v31, %v1879_v52  ;;  %v685_v38 = vadd.f32 %v1353_v32, %v1879_v52 }
 0x135   : > { %v1307_v39 = vpop.f32.mrf.mxu0  ;;  %v1355_v40 = vpop.f32.mrf.mxu1 }
 0x136   : > { %1260 = vst [vmem:[%s1888_s29 + $0x8] sm:$0xff] %v1188_v35   ;;  %1268 = vst [vmem:[%s1888_s29 + $0x48] sm:$0xff] %v1228_v36   ;;  %v1308_v41 = vadd.f32 %v1307_v39, %v1306_v33  ;;  %v1356_v42 = vadd.f32 %v1355_v40, %v1354_v34  ;;  %v735_v47 = vmax.f32 %v621_v37, 0.0  ;;  %v751_v48 = vmax.f32 %v685_v38, 0.0 }
 0x137   : > { %v1309_v43 = vpop.f32.mrf.mxu0  ;;  %v1357_v44 = vpop.f32.mrf.mxu1 }
 0x138   : > { %v624_v45 = vadd.f32 %v1308_v41, %v1879_v52  ;;  %v688_v46 = vadd.f32 %v1356_v42, %v1879_v52 }
 0x139   : > { %v1310_v49 = vpop.f32.mrf.mxu0  ;;  %v1358_v50 = vpop.f32.mrf.mxu1 }
 0x13a   : > { %v736_v51 = vmax.f32 %v624_v45, 0.0  ;;  %v752_v53 = vmax.f32 %v688_v46, 0.0  ;;  %v1311_v54 = vadd.f32 %v1310_v49, %v1309_v43  ;;  %v1359_v55 = vadd.f32 %v1358_v50, %v1357_v44 }
 0x13b   : > { %v1312_v56 = vpop.f32.mrf.mxu0  ;;  %v1360_v57 = vpop.f32.mrf.mxu1 }
 0x13c   : > { %v1193_v58 = vpack.c.bf16 %v736_v51, %v735_v47  ;;  %v1233_v59 = vpack.c.bf16 %v752_v53, %v751_v48  ;;  %v629_v60 = vadd.f32 %v1311_v54, %v1879_v52  ;;  %v693_v61 = vadd.f32 %v1359_v55, %v1879_v52 }
 0x13d   : > { %v1313_v62 = vpop.f32.mrf.mxu0  ;;  %v1361_v63 = vpop.f32.mrf.mxu1 }
 0x13e   : > { %1261 = vst [vmem:[%s1888_s29 + $0x10] sm:$0xff] %v1193_v58   ;;  %1269 = vst [vmem:[%s1888_s29 + $0x50] sm:$0xff] %v1233_v59   ;;  %v1314_v0 = vadd.f32 %v1313_v62, %v1312_v56  ;;  %v1362_v1 = vadd.f32 %v1361_v63, %v1360_v57  ;;  %v737_v6 = vmax.f32 %v629_v60, 0.0  ;;  %v753_v7 = vmax.f32 %v693_v61, 0.0 }
 0x13f   : > { %v1315_v2 = vpop.f32.mrf.mxu0  ;;  %v1363_v3 = vpop.f32.mrf.mxu1 }
 0x140   : > { %v632_v4 = vadd.f32 %v1314_v0, %v1879_v52  ;;  %v696_v5 = vadd.f32 %v1362_v1, %v1879_v52 }
 0x141   : > { %v1316_v8 = vpop.f32.mrf.mxu0  ;;  %v1364_v9 = vpop.f32.mrf.mxu1 }
 0x142   : > { %v738_v10 = vmax.f32 %v632_v4, 0.0  ;;  %v754_v11 = vmax.f32 %v696_v5, 0.0  ;;  %v1317_v12 = vadd.f32 %v1316_v8, %v1315_v2  ;;  %v1365_v13 = vadd.f32 %v1364_v9, %v1363_v3 }
 0x143   : > { %v1318_v14 = vpop.f32.mrf.mxu0  ;;  %v1366_v15 = vpop.f32.mrf.mxu1 }
 0x144   : > { %v1198_v16 = vpack.c.bf16 %v738_v10, %v737_v6  ;;  %v1238_v17 = vpack.c.bf16 %v754_v11, %v753_v7  ;;  %v637_v18 = vadd.f32 %v1317_v12, %v1879_v52  ;;  %v701_v19 = vadd.f32 %v1365_v13, %v1879_v52 }
 0x145   : > { %v1319_v20 = vpop.f32.mrf.mxu0  ;;  %v1367_v21 = vpop.f32.mrf.mxu1 }
 0x146   : > { %1262 = vst [vmem:[%s1888_s29 + $0x18] sm:$0xff] %v1198_v16   ;;  %1270 = vst [vmem:[%s1888_s29 + $0x58] sm:$0xff] %v1238_v17   ;;  %v1320_v22 = vadd.f32 %v1319_v20, %v1318_v14  ;;  %v1368_v23 = vadd.f32 %v1367_v21, %v1366_v15  ;;  %v739_v28 = vmax.f32 %v637_v18, 0.0  ;;  %v755_v29 = vmax.f32 %v701_v19, 0.0 }
 0x147   : > { %v1321_v24 = vpop.f32.mrf.mxu0  ;;  %v1369_v25 = vpop.f32.mrf.mxu1 }
 0x148   : > { %v640_v26 = vadd.f32 %v1320_v22, %v1879_v52  ;;  %v704_v27 = vadd.f32 %v1368_v23, %v1879_v52 }
 0x149   : > { %v1322_v30 = vpop.f32.mrf.mxu0  ;;  %v1370_v31 = vpop.f32.mrf.mxu1 }
 0x14a   : > { %v740_v32 = vmax.f32 %v640_v26, 0.0  ;;  %v756_v33 = vmax.f32 %v704_v27, 0.0  ;;  %v1323_v34 = vadd.f32 %v1322_v30, %v1321_v24  ;;  %v1371_v35 = vadd.f32 %v1370_v31, %v1369_v25 }
 0x14b   : > { %v1324_v36 = vpop.f32.mrf.mxu0  ;;  %v1372_v37 = vpop.f32.mrf.mxu1 }
 0x14c   : > { %v1203_v38 = vpack.c.bf16 %v740_v32, %v739_v28  ;;  %v1243_v39 = vpack.c.bf16 %v756_v33, %v755_v29  ;;  %v645_v40 = vadd.f32 %v1323_v34, %v1879_v52  ;;  %v709_v41 = vadd.f32 %v1371_v35, %v1879_v52 }
 0x14d   : > { %v1325_v42 = vpop.f32.mrf.mxu0  ;;  %v1373_v43 = vpop.f32.mrf.mxu1 }
 0x14e   : > { %1263 = vst [vmem:[%s1888_s29 + $0x20] sm:$0xff] %v1203_v38   ;;  %1271 = vst [vmem:[%s1888_s29 + $0x60] sm:$0xff] %v1243_v39   ;;  %v1326_v44 = vadd.f32 %v1325_v42, %v1324_v36  ;;  %v1374_v45 = vadd.f32 %v1373_v43, %v1372_v37  ;;  %v741_v50 = vmax.f32 %v645_v40, 0.0  ;;  %v757_v51 = vmax.f32 %v709_v41, 0.0 }
 0x14f   : > { %v1327_v46 = vpop.f32.mrf.mxu0  ;;  %v1375_v47 = vpop.f32.mrf.mxu1 }
 0x150   : > { %v648_v48 = vadd.f32 %v1326_v44, %v1879_v52  ;;  %v712_v49 = vadd.f32 %v1374_v45, %v1879_v52 }
 0x151   : > { %v1328_v53 = vpop.f32.mrf.mxu0  ;;  %v1376_v54 = vpop.f32.mrf.mxu1 }
 0x152   : > { %v742_v55 = vmax.f32 %v648_v48, 0.0  ;;  %v758_v56 = vmax.f32 %v712_v49, 0.0  ;;  %v1329_v57 = vadd.f32 %v1328_v53, %v1327_v46  ;;  %v1377_v58 = vadd.f32 %v1376_v54, %v1375_v47 }
 0x153   : > { %v1330_v59 = vpop.f32.mrf.mxu0  ;;  %v1378_v60 = vpop.f32.mrf.mxu1 }
 0x154   : > { %v1208_v61 = vpack.c.bf16 %v742_v55, %v741_v50  ;;  %v1248_v62 = vpack.c.bf16 %v758_v56, %v757_v51  ;;  %v653_v63 = vadd.f32 %v1329_v57, %v1879_v52  ;;  %v717_v0 = vadd.f32 %v1377_v58, %v1879_v52 }
 0x155   : > { %v1331_v1 = vpop.f32.mrf.mxu0  ;;  %v1379_v2 = vpop.f32.mrf.mxu1 }
 0x156   : > { %1264 = vst [vmem:[%s1888_s29 + $0x28] sm:$0xff] %v1208_v61   ;;  %1272 = vst [vmem:[%s1888_s29 + $0x68] sm:$0xff] %v1248_v62   ;;  %v1332_v3 = vadd.f32 %v1331_v1, %v1330_v59  ;;  %v1380_v4 = vadd.f32 %v1379_v2, %v1378_v60  ;;  %v743_v9 = vmax.f32 %v653_v63, 0.0  ;;  %v759_v10 = vmax.f32 %v717_v0, 0.0 }
 0x157   : > { %v1333_v5 = vpop.f32.mrf.mxu0  ;;  %v1381_v6 = vpop.f32.mrf.mxu1 }
 0x158   : > { %v656_v7 = vadd.f32 %v1332_v3, %v1879_v52  ;;  %v720_v8 = vadd.f32 %v1380_v4, %v1879_v52 }
 0x159   : > { %v1334_v11 = vpop.f32.mrf.mxu0  ;;  %v1382_v12 = vpop.f32.mrf.mxu1 }
 0x15a   : > { %v744_v13 = vmax.f32 %v656_v7, 0.0  ;;  %v760_v14 = vmax.f32 %v720_v8, 0.0  ;;  %v1335_v15 = vadd.f32 %v1334_v11, %v1333_v5  ;;  %v1383_v16 = vadd.f32 %v1382_v12, %v1381_v6 }
 0x15b   : > { %v1336_v17 = vpop.f32.mrf.mxu0  ;;  %v1384_v18 = vpop.f32.mrf.mxu1 }
 0x15c   : > { %v1213_v19 = vpack.c.bf16 %v744_v13, %v743_v9  ;;  %v1253_v20 = vpack.c.bf16 %v760_v14, %v759_v10  ;;  %v661_v23 = vadd.f32 %v1335_v15, %v1879_v52  ;;  %v725_v24 = vadd.f32 %v1383_v16, %v1879_v52 }
 0x15d   : > { %v1337_v21 = vpop.f32.mrf.mxu0  ;;  %v1385_v22 = vpop.f32.mrf.mxu1 }
 0x15e   : > { %1265 = vst [vmem:[%s1888_s29 + $0x30] sm:$0xff] %v1213_v19   ;;  %1273 = vst [vmem:[%s1888_s29 + $0x70] sm:$0xff] %v1253_v20   ;;  %v1338_v25 = vadd.f32 %v1337_v21, %v1336_v17  ;;  %v1386_v26 = vadd.f32 %v1385_v22, %v1384_v18  ;;  %v745_v29 = vmax.f32 %v661_v23, 0.0  ;;  %v761_v30 = vmax.f32 %v725_v24, 0.0 }
 0x160   : > { %v664_v27 = vadd.f32 %v1338_v25, %v1879_v52  ;;  %v728_v28 = vadd.f32 %v1386_v26, %v1879_v52 }
 0x162   : > { %v746_v31 = vmax.f32 %v664_v27, 0.0  ;;  %v762_v32 = vmax.f32 %v728_v28, 0.0 }
 0x164   : > { %v1218_v33 = vpack.c.bf16 %v746_v31, %v745_v29  ;;  %v1258_v34 = vpack.c.bf16 %v762_v32, %v761_v30 }
 0x166   : > { %1266 = vst [vmem:[%s1888_s29 + $0x38] sm:$0xff] %v1218_v33   ;;  %1274 = vst [vmem:[%s1888_s29 + $0x78] sm:$0xff] %v1258_v34  }
 0x167   : > { %1613 = shalt.err (!%p1610_p5)
}
 0x168   : > { %s1614_s26 = scalar_lea.hbm %s1935_s7, 2048  ;;  %s1618_s20 = scalar_lea.hbm %s1990_s3, 4096 }
 0x169   : > { %p1615_p7 = scmp.ne.s32.totalorder %s1935_s7, %s1614_s26  ;;  %p1619_p9 = scmp.lt.s32.totalorder %s1935_s7, %s1990_s3 }
 0x16a   : > { %p1620_p11 = scmp.lt.s32.totalorder %s1618_s20, %s1614_s26 }
 0x16b   : > { %p1616_p6 = pnand %p1615_p7, %p1802_p13 }
 0x16c   : > { %p1621_p12 = por %p1620_p11, %p1619_p9 }
 0x16d   : > { %p1617_p4 = pneg %p1616_p6 }
 0x16f   : > { %p1622_p1 = pnand %p1621_p12, %p1617_p4 }
 0x171   : > { %1625 = shalt.err (!%p1622_p1)
}
 0x172   : > { %s1693_s29 = smov 64   ;;  %s1694_s4 = smov 4  }
 0x173   : > { %1409 = dma.vmem_to_hbm [thread:$0]  (%p1802_p13), %s1937_s21, 2048, %s1935_s7, %s924_s15, %s1693_s29, %s1693_s29, %s1694_s4  }
 0x174 PF: > { %s953_s5 = sand.u32 1, %s1664_s12   ;;  %p2002_p8 = scmp.ne.s32.totalorder %s1995_s23, 0 }
 0x175   : > { %p2003_p10 = scmp.ge.s32.totalorder %s1684_s17, 2  ;;  %s954_s6 = scalar_lea.sflag [#allocation4], %s953_s5 }
 0x177   : > { %p1420_p0 = pnand %p2003_p10, %p2002_p8 }
 0x179   : > { %p1421_p2 = pneg %p1420_p0 }
 0x17b   : > { %1659 = dma.done.wait (%p1421_p2), %s954_s6, 2048  }
 0x17c   : > { %1661 = vsyncadd (%p1421_p2), %s954_s6, 4294965248  ;;  %s20_s17 = sadd.s32 1, %s1684_s17   ;;  %s2004_s12 = smov %s1668_s13 }
 0x17d   : > { %p17_p3 = scmp.ge.s32.totalorder %s20_s17, 4   ;;  %s2005_s13 = smov %s1672_s14 }
 0x17e   : > { %s2006_s14 = smov %s1811_s19  ;;  %s2007_s15 = smov %s1680_s16 }
 0x17f   : > { %s2008_s16 = smov %s2010_s28  ;;  %19 = sbr.rel (!%p17_p3) target bundleno = 7 (0x7), region = 85 }
 0x184   :  { %959 = vsyncpa [#allocation3], 1 }
 0x185   :  { %961 = vsyncpa [#allocation3 + $0x1], 1 }
 0x186   :  { %962 = vsyncpa [#allocation6], 1 }
 0x187   :  { %963 = vsyncpa [#allocation4], 1 }
 0x188   :  { %965 = vsyncpa [#allocation4 + $0x1], 1 }

</bundles_post_ra>
